<compile_context>
chip_gen: v7x
topology: tpu7x:2x2x1
jax: 0.10.0
libtpu: 0.0.40
codegen_flags: <defaults>
</compile_context>

<pallas_src>
import math

import numpy as np
import jax
import jax.numpy as jnp
from jax.experimental import pallas as pl
from jax.experimental.pallas import tpu as pltpu

# ---- problem sizes (small, consistent with the module defaults) ----
BATCH = 16
INPUT_DIM = 64
OUTPUT_DIM = 10
DEPTH = 5                      # module default
N_INT = 2 ** DEPTH - 1         # 31 internal nodes
N_LEAF = 2 ** DEPTH            # 32 leaves


def _build_routing(depth):
    """Host-side precomputation of the tree routing.

    D[l] : [n_int, n_leaf]  +1 where leaf j goes LEFT through node n at level l,
                            -1 where it goes RIGHT, 0 elsewhere.
    r[l] : [1, n_leaf]       1 where leaf j goes RIGHT at level l, else 0.
    Then  p @ D[l] + r[l]  ==  p_ancestor (left)  or  1 - p_ancestor (right),
    exactly matching the PyTorch doubling loop's per-level factors.
    """
    n_int, n_leaf = 2 ** depth - 1, 2 ** depth
    D = np.zeros((depth, n_int, n_leaf), np.float32)
    r = np.zeros((depth, 1, n_leaf), np.float32)
    for l in range(depth):
        for j in range(n_leaf):
            a = j >> (depth - l)                 # level-local ancestor index
            node = (2 ** l - 1) + a              # global internal-node index
            go_right = (j >> (depth - l - 1)) & 1
            if go_right:
                D[l, node, j] = -1.0
                r[l, 0, j] = 1.0
            else:
                D[l, node, j] = 1.0
    return jnp.asarray(D), jnp.asarray(r)


def _sdt_kernel(x_ref, w_in_ref, d_ref, r_ref, w_leaf_ref, out_ref):
    x = x_ref[...]                                                   # [B, in]

    # inner_nodes: Linear (no bias) + Sigmoid
    z = jnp.dot(x, w_in_ref[...], preferred_element_type=jnp.float32)  # [B, n_int]
    p = 1.0 / (1.0 + jnp.exp(-z))                                    # sigmoid (exp -> EUP)

    # mu[b, j] = prod over levels of (p or 1-p of leaf-j's ancestor at that level)
    mu = jnp.dot(p, d_ref[0], preferred_element_type=jnp.float32) + r_ref[0]
    for l in range(1, DEPTH):                                        # static unroll
        factor = jnp.dot(p, d_ref[l], preferred_element_type=jnp.float32) + r_ref[l]
        mu = mu * factor                                             # [B, n_leaf]

    # leaf_nodes: Linear (no bias)
    out_ref[...] = jnp.dot(mu, w_leaf_ref[...], preferred_element_type=jnp.float32)


def sdt_forward(x, w_inner_t, w_leaf_t, d_mats, r_vecs):
    """x: [B, input_dim]; w_inner_t: [input_dim, n_int]; w_leaf_t: [n_leaf, output_dim]."""
    b, in_dim = x.shape
    out_dim = w_leaf_t.shape[1]

    full = lambda shape: pl.BlockSpec(shape, lambda i: (0,) * len(shape))

    return pl.pallas_call(
        _sdt_kernel,
        out_shape=jax.ShapeDtypeStruct((b, out_dim), jnp.float32),
        grid=(1,),                                     # single step: whole batch fused
        in_specs=[
            full((b, in_dim)),                         # X
            full((in_dim, N_INT)),                     # W_inner (pre-transposed)
            full((DEPTH, N_INT, N_LEAF)),              # routing D
            full((DEPTH, 1, N_LEAF)),                  # routing r
            full((N_LEAF, out_dim)),                   # W_leaf (pre-transposed)
        ],
        out_specs=full((b, out_dim)),
        compiler_params=pltpu.CompilerParams(
            dimension_semantics=("arbitrary",),
            vmem_limit_bytes=16 * 1024 * 1024,         # tiny footprint; safe on v7x
        ),
    )(x, w_inner_t, d_mats, r_vecs, w_leaf_t)


# ------------------------- pure-JAX reference (mirrors PyTorch exactly) -------------------------
def _reference(x, w_inner_pt, w_leaf_pt, depth):
    # w_inner_pt: [n_int, input_dim], w_leaf_pt: [output_dim, n_leaf]  (PyTorch layouts)
    b = x.shape[0]
    p = jax.nn.sigmoid(x @ w_inner_pt.T)                     # [B, n_int]
    pp = jnp.stack([p, 1.0 - p], axis=2)                     # [B, n_int, 2]
    mu = jnp.ones((b, 1, 1), x.dtype)
    begin, end = 0, 1
    for l in range(depth):
        _pp = pp[:, begin:end, :]
        mu = mu.reshape(b, -1, 1)
        mu = jnp.concatenate([mu, mu], axis=2)               # repeat(1, 1, 2)
        mu = mu * _pp
        begin, end = end, end + 2 ** (l + 1)
    mu = mu.reshape(b, 2 ** depth)
    return mu @ w_leaf_pt.T


if __name__ == "__main__":
    key = jax.random.PRNGKey(0)
    kx, k1, k2 = jax.random.split(key, 3)

    x = jax.random.normal(kx, (BATCH, INPUT_DIM), jnp.float32)

    # PyTorch nn.Linear default init: U(-1/sqrt(fan_in), 1/sqrt(fan_in)), bias=False
    lim1 = 1.0 / math.sqrt(INPUT_DIM)
    w_inner_pt = jax.random.uniform(k1, (N_INT, INPUT_DIM), jnp.float32, -lim1, lim1)
    lim2 = 1.0 / math.sqrt(N_LEAF)
    w_leaf_pt = jax.random.uniform(k2, (OUTPUT_DIM, N_LEAF), jnp.float32, -lim2, lim2)

    d_mats, r_vecs = _build_routing(DEPTH)

    out = sdt_forward(x, w_inner_pt.T, w_leaf_pt.T, d_mats, r_vecs)
    out = jax.block_until_ready(out)

    ref = _reference(x, w_inner_pt, w_leaf_pt, DEPTH)
    assert out.shape == (BATCH, OUTPUT_DIM)
    max_err = jnp.max(jnp.abs(out - ref))
    assert jnp.allclose(out, ref, atol=2e-4, rtol=2e-4), f"max abs diff {max_err}"

    print("KERNEL_OK")
</pallas_src>

<mosaic_0001>
module attributes {stable_mosaic.version = 11 : i64} {
  func.func @_sdt_kernel(%arg0: i32, %arg1: memref<16x64xf32, #tpu.memory_space<vmem>>, %arg2: memref<64x31xf32, #tpu.memory_space<vmem>>, %arg3: memref<5x31x32xf32, #tpu.memory_space<vmem>>, %arg4: memref<5x1x32xf32, #tpu.memory_space<vmem>>, %arg5: memref<32x10xf32, #tpu.memory_space<vmem>>, %arg6: memref<16x10xf32, #tpu.memory_space<vmem>>) attributes {dimension_semantics = [#tpu.dimension_semantics<arbitrary>], iteration_bounds = array<i64: 1>, scalar_prefetch = 0 : i64, scratch_operands = 0 : i64, tpu.core_type = #tpu.core_type<tc>, window_params = [{pipeline_mode = #tpu.pipeline_mode<synchronous>, transform_indices = @transform_0, window_bounds = array<i64: 16, 64>}, {pipeline_mode = #tpu.pipeline_mode<synchronous>, transform_indices = @transform_1, window_bounds = array<i64: 64, 31>}, {pipeline_mode = #tpu.pipeline_mode<synchronous>, transform_indices = @transform_2, window_bounds = array<i64: 5, 31, 32>}, {pipeline_mode = #tpu.pipeline_mode<synchronous>, transform_indices = @transform_3, window_bounds = array<i64: 5, 1, 32>}, {pipeline_mode = #tpu.pipeline_mode<synchronous>, transform_indices = @transform_4, window_bounds = array<i64: 32, 10>}, {pipeline_mode = #tpu.pipeline_mode<synchronous>, transform_indices = @transform_5, window_bounds = array<i64: 16, 10>}]} {
    %c0 = arith.constant 0 : index
    %c0_0 = arith.constant 0 : index
    %0 = vector.load %arg1[%c0, %c0_0] : memref<16x64xf32, #tpu.memory_space<vmem>>, vector<16x64xf32>
    %c0_1 = arith.constant 0 : index
    %c0_2 = arith.constant 0 : index
    %1 = vector.load %arg2[%c0_1, %c0_2] : memref<64x31xf32, #tpu.memory_space<vmem>>, vector<64x31xf32>
    %cst = arith.constant dense<0.000000e+00> : vector<16x31xf32>
    %2 = tpu.matmul %0, %1, %cst {dimension_numbers = #tpu.dot_dimension_numbers<[1], [0], [0], [1], [0, 0, 1, 1], [], []>} : vector<16x64xf32>, vector<64x31xf32>, vector<16x31xf32> -> vector<16x31xf32>
    %cst_3 = arith.constant 0.000000e+00 : f32
    %3 = vector.broadcast %cst_3 : f32 to vector<16x31xf32>
    %4 = arith.subf %3, %2 : vector<16x31xf32>
    %5 = math.exp %4 : vector<16x31xf32>
    %cst_4 = arith.constant 1.000000e+00 : f32
    %6 = vector.broadcast %cst_4 : f32 to vector<16x31xf32>
    %7 = arith.addf %6, %5 : vector<16x31xf32>
    %cst_5 = arith.constant 1.000000e+00 : f32
    %8 = vector.broadcast %cst_5 : f32 to vector<16x31xf32>
    %9 = arith.divf %8, %7 : vector<16x31xf32>
    %c0_6 = arith.constant 0 : index
    %c0_7 = arith.constant 0 : index
    %c0_8 = arith.constant 0 : index
    %10 = vector.load %arg3[%c0_6, %c0_7, %c0_8] : memref<5x31x32xf32, #tpu.memory_space<vmem>>, vector<1x31x32xf32>
    %11 = vector.shape_cast %10 : vector<1x31x32xf32> to vector<31x32xf32>
    %cst_9 = arith.constant dense<0.000000e+00> : vector<16x32xf32>
    %12 = tpu.matmul %9, %11, %cst_9 {dimension_numbers = #tpu.dot_dimension_numbers<[1], [0], [0], [1], [0, 0, 1, 1], [], []>} : vector<16x31xf32>, vector<31x32xf32>, vector<16x32xf32> -> vector<16x32xf32>
    %c0_10 = arith.constant 0 : index
    %c0_11 = arith.constant 0 : index
    %c0_12 = arith.constant 0 : index
    %13 = vector.load %arg4[%c0_10, %c0_11, %c0_12] : memref<5x1x32xf32, #tpu.memory_space<vmem>>, vector<1x1x32xf32>
    %14 = vector.shape_cast %13 : vector<1x1x32xf32> to vector<1x32xf32>
    %15 = vector.broadcast %14 : vector<1x32xf32> to vector<16x32xf32>
    %16 = arith.addf %12, %15 : vector<16x32xf32>
    %c1 = arith.constant 1 : index
    %c0_13 = arith.constant 0 : index
    %c0_14 = arith.constant 0 : index
    %17 = vector.load %arg3[%c1, %c0_13, %c0_14] : memref<5x31x32xf32, #tpu.memory_space<vmem>>, vector<1x31x32xf32>
    %18 = vector.shape_cast %17 : vector<1x31x32xf32> to vector<31x32xf32>
    %cst_15 = arith.constant dense<0.000000e+00> : vector<16x32xf32>
    %19 = tpu.matmul %9, %18, %cst_15 {dimension_numbers = #tpu.dot_dimension_numbers<[1], [0], [0], [1], [0, 0, 1, 1], [], []>} : vector<16x31xf32>, vector<31x32xf32>, vector<16x32xf32> -> vector<16x32xf32>
    %c1_16 = arith.constant 1 : index
    %c0_17 = arith.constant 0 : index
    %c0_18 = arith.constant 0 : index
    %20 = vector.load %arg4[%c1_16, %c0_17, %c0_18] : memref<5x1x32xf32, #tpu.memory_space<vmem>>, vector<1x1x32xf32>
    %21 = vector.shape_cast %20 : vector<1x1x32xf32> to vector<1x32xf32>
    %22 = vector.broadcast %21 : vector<1x32xf32> to vector<16x32xf32>
    %23 = arith.addf %19, %22 : vector<16x32xf32>
    %24 = arith.mulf %16, %23 : vector<16x32xf32>
    %c2 = arith.constant 2 : index
    %c0_19 = arith.constant 0 : index
    %c0_20 = arith.constant 0 : index
    %25 = vector.load %arg3[%c2, %c0_19, %c0_20] : memref<5x31x32xf32, #tpu.memory_space<vmem>>, vector<1x31x32xf32>
    %26 = vector.shape_cast %25 : vector<1x31x32xf32> to vector<31x32xf32>
    %cst_21 = arith.constant dense<0.000000e+00> : vector<16x32xf32>
    %27 = tpu.matmul %9, %26, %cst_21 {dimension_numbers = #tpu.dot_dimension_numbers<[1], [0], [0], [1], [0, 0, 1, 1], [], []>} : vector<16x31xf32>, vector<31x32xf32>, vector<16x32xf32> -> vector<16x32xf32>
    %c2_22 = arith.constant 2 : index
    %c0_23 = arith.constant 0 : index
    %c0_24 = arith.constant 0 : index
    %28 = vector.load %arg4[%c2_22, %c0_23, %c0_24] : memref<5x1x32xf32, #tpu.memory_space<vmem>>, vector<1x1x32xf32>
    %29 = vector.shape_cast %28 : vector<1x1x32xf32> to vector<1x32xf32>
    %30 = vector.broadcast %29 : vector<1x32xf32> to vector<16x32xf32>
    %31 = arith.addf %27, %30 : vector<16x32xf32>
    %32 = arith.mulf %24, %31 : vector<16x32xf32>
    %c3 = arith.constant 3 : index
    %c0_25 = arith.constant 0 : index
    %c0_26 = arith.constant 0 : index
    %33 = vector.load %arg3[%c3, %c0_25, %c0_26] : memref<5x31x32xf32, #tpu.memory_space<vmem>>, vector<1x31x32xf32>
    %34 = vector.shape_cast %33 : vector<1x31x32xf32> to vector<31x32xf32>
    %cst_27 = arith.constant dense<0.000000e+00> : vector<16x32xf32>
    %35 = tpu.matmul %9, %34, %cst_27 {dimension_numbers = #tpu.dot_dimension_numbers<[1], [0], [0], [1], [0, 0, 1, 1], [], []>} : vector<16x31xf32>, vector<31x32xf32>, vector<16x32xf32> -> vector<16x32xf32>
    %c3_28 = arith.constant 3 : index
    %c0_29 = arith.constant 0 : index
    %c0_30 = arith.constant 0 : index
    %36 = vector.load %arg4[%c3_28, %c0_29, %c0_30] : memref<5x1x32xf32, #tpu.memory_space<vmem>>, vector<1x1x32xf32>
    %37 = vector.shape_cast %36 : vector<1x1x32xf32> to vector<1x32xf32>
    %38 = vector.broadcast %37 : vector<1x32xf32> to vector<16x32xf32>
    %39 = arith.addf %35, %38 : vector<16x32xf32>
    %40 = arith.mulf %32, %39 : vector<16x32xf32>
    %c4 = arith.constant 4 : index
    %c0_31 = arith.constant 0 : index
    %c0_32 = arith.constant 0 : index
    %41 = vector.load %arg3[%c4, %c0_31, %c0_32] : memref<5x31x32xf32, #tpu.memory_space<vmem>>, vector<1x31x32xf32>
    %42 = vector.shape_cast %41 : vector<1x31x32xf32> to vector<31x32xf32>
    %cst_33 = arith.constant dense<0.000000e+00> : vector<16x32xf32>
    %43 = tpu.matmul %9, %42, %cst_33 {dimension_numbers = #tpu.dot_dimension_numbers<[1], [0], [0], [1], [0, 0, 1, 1], [], []>} : vector<16x31xf32>, vector<31x32xf32>, vector<16x32xf32> -> vector<16x32xf32>
    %c4_34 = arith.constant 4 : index
    %c0_35 = arith.constant 0 : index
    %c0_36 = arith.constant 0 : index
    %44 = vector.load %arg4[%c4_34, %c0_35, %c0_36] : memref<5x1x32xf32, #tpu.memory_space<vmem>>, vector<1x1x32xf32>
    %45 = vector.shape_cast %44 : vector<1x1x32xf32> to vector<1x32xf32>
    %46 = vector.broadcast %45 : vector<1x32xf32> to vector<16x32xf32>
    %47 = arith.addf %43, %46 : vector<16x32xf32>
    %48 = arith.mulf %40, %47 : vector<16x32xf32>
    %c0_37 = arith.constant 0 : index
    %c0_38 = arith.constant 0 : index
    %49 = vector.load %arg5[%c0_37, %c0_38] : memref<32x10xf32, #tpu.memory_space<vmem>>, vector<32x10xf32>
    %cst_39 = arith.constant dense<0.000000e+00> : vector<16x10xf32>
    %50 = tpu.matmul %48, %49, %cst_39 {dimension_numbers = #tpu.dot_dimension_numbers<[1], [0], [0], [1], [0, 0, 1, 1], [], []>} : vector<16x32xf32>, vector<32x10xf32>, vector<16x10xf32> -> vector<16x10xf32>
    %c0_40 = arith.constant 0 : index
    %c0_41 = arith.constant 0 : index
    %51 = vector.load %arg6[%c0_40, %c0_41] : memref<16x10xf32, #tpu.memory_space<vmem>>, vector<16x10xf32>
    tpu.vector_store %arg6[%c0_40, %c0_41], %50 {strides = array<i32>} : memref<16x10xf32, #tpu.memory_space<vmem>>, vector<16x10xf32>,
    return
  }
  func.func @transform_0(%arg0: i32) -> (i32, i32) {
    %c0_i32 = arith.constant 0 : i32
    %c0_i32_0 = arith.constant 0 : i32
    %c0_i32_1 = arith.constant 0 : i32
    return %c0_i32, %c0_i32_0 : i32, i32
  }
  func.func @transform_1(%arg0: i32) -> (i32, i32) {
    %c0_i32 = arith.constant 0 : i32
    %c0_i32_0 = arith.constant 0 : i32
    %c0_i32_1 = arith.constant 0 : i32
    return %c0_i32, %c0_i32_0 : i32, i32
  }
  func.func @transform_2(%arg0: i32) -> (i32, i32, i32) {
    %c0_i32 = arith.constant 0 : i32
    %c0_i32_0 = arith.constant 0 : i32
    %c0_i32_1 = arith.constant 0 : i32
    %c0_i32_2 = arith.constant 0 : i32
    return %c0_i32, %c0_i32_0, %c0_i32_1 : i32, i32, i32
  }
  func.func @transform_3(%arg0: i32) -> (i32, i32, i32) {
    %c0_i32 = arith.constant 0 : i32
    %c0_i32_0 = arith.constant 0 : i32
    %c0_i32_1 = arith.constant 0 : i32
    %c0_i32_2 = arith.constant 0 : i32
    return %c0_i32, %c0_i32_0, %c0_i32_1 : i32, i32, i32
  }
  func.func @transform_4(%arg0: i32) -> (i32, i32) {
    %c0_i32 = arith.constant 0 : i32
    %c0_i32_0 = arith.constant 0 : i32
    %c0_i32_1 = arith.constant 0 : i32
    return %c0_i32, %c0_i32_0 : i32, i32
  }
  func.func @transform_5(%arg0: i32) -> (i32, i32) {
    %c0_i32 = arith.constant 0 : i32
    %c0_i32_0 = arith.constant 0 : i32
    %c0_i32_1 = arith.constant 0 : i32
    return %c0_i32, %c0_i32_0 : i32, i32
  }
}

</mosaic_0001>

<bundles_post_ra>
// kernel: tpu_custom_call.1
= control target key start
LH: loop header
LB: loop body
LE: loop exit
PB: predicated region body
PF: predicated region fallthrough
CT: control target
= control target key end

     0   :  { %10 = vsyncpa [#allocation3], 0  ;;  %s1166_s0 = inlined_call_operand.vmem [shape: f32[16,64], index: 0, kind: input, shape index: {}]   ;;  %s1167_s1 = inlined_call_operand.vmem [shape: f32[64,31], index: 1, kind: input, shape index: {}]   ;;  %s1168_s2 = inlined_call_operand.hbm [shape: f32[5,31,32], index: 2, kind: input, shape index: {}]   ;;  %s1169_s3 = inlined_call_operand.vmem [shape: f32[5,1,32], index: 3, kind: input, shape index: {}]   ;;  %s1170_s4 = inlined_call_operand.vmem [shape: f32[32,10], index: 4, kind: input, shape index: {}]   ;;  %s1171_s5 = inlined_call_operand.hbm [shape: f32[16,10], index: 5, kind: output, shape index: {}]  }
   0x1   :  { %11 = vsyncpa [#allocation4], 0  ;;  %s1008_s18 = smov [#allocation2]   ;;  %s960_s22 = scalar_lea.hbm %s1168_s2, 2560 }
   0x2   :  { %s21_s19 = sshll.u32 %s1008_s18, 4  ;;  %p961_p0 = scmp.ne.s32.totalorder %s1168_s2, %s960_s22  ;;  %s22_s19 = int_to_ptr.vmem [resolvable:$true] %s21_s19 }
   0x3   :  { %p964_p1 = scmp.lt.u32.totalorder %s960_s22, %s1168_s2 }
   0x5   :  { %p966_p2 = pnand %p964_p1, %p961_p0 }
   0x7   :  { %969 = shalt.err (!%p966_p2)
}
   0x8   :  { %s970_s27 = scalar_lea.vmem %s22_s19, 2560  ;;  %p975_p4 = scmp.lt.s32.totalorder %s22_s19, %s22_s19 }
   0x9   :  { %p971_p3 = scmp.ne.s32.totalorder %s22_s19, %s970_s27  ;;  %p976_p5 = scmp.lt.s32.totalorder %s970_s27, %s970_s27 }
   0xb   :  { %p977_p6 = por %p976_p5, %p975_p4 }
   0xd   :  { %p978_p7 = pnand %p977_p6, %p971_p3 }
   0xf   :  { %981 = shalt.err (!%p978_p7)
}
  0x10   :  { %s1009_s28 = smov 128   ;;  %s1010_s29 = smov 8  }
  0x11   :  { %27 = dma.hbm_to_vmem [thread:$0]  %s1168_s2, 2560, %s22_s19, [#allocation3], %s1009_s28, %s1009_s28, %s1010_s29  }
  0x12   :  { %1004 = dma.done.wait [#allocation3], 2560  }
  0x13   :  { %1005 = vsyncadd [#allocation3], 4294964736  ;;  %v37_v0 = vld [vmem:[%s1167_s1] sm:$0xff]  ;;  %v38_v1 = vld [vmem:[%s1167_s1 + $0x8] sm:$0xff]  ;;  %vm45_vm0 = vcmask 523264   ;;  %vm157_vm1 = vcmask 1046528  }
  0x14   :  { %v39_v2 = vld [vmem:[%s1167_s1 + $0x10] sm:$0xff]  ;;  %v873_v3 = vpack.c.bf16 %v38_v1, %v37_v0  ;;  %v40_v4 = vld [vmem:[%s1167_s1 + $0x18] sm:$0xff]  ;;  %v41_v6 = vld [vmem:[%s1167_s1 + $0x20] sm:$0xff]  ;;  %vm1011_vm2 = vmmov 1   ;;  %vm150_vm4 = vcmask 252928   ;;  %vm612_vm5 = vcmask 261120  }
  0x15   :  { %v877_v5 = vpack.c.bf16 %v40_v4, %v39_v2  ;;  %v42_v7 = vld [vmem:[%s1167_s1 + $0x28] sm:$0xff]  ;;  %v35_v8 = vld [vmem:[%s1166_s0] sm:$0xff]  ;;  %v43_v10 = vld [vmem:[%s1167_s1 + $0x30] sm:$0xff]  ;;  %s1012_s17 = smov [#allocation5]   ;;  %vm694_vm6 = vcmask 80896  }
  0x16   :  { %874 = vmatprep.subr.bf16.mxu0 %v873_v3  ;;  %804 = vmatprep.mubr.msk.f32.mxu0 %vm45_vm0, %v35_v8  ;;  %v881_v9 = vpack.c.bf16 %v42_v7, %v41_v6  ;;  %v44_v11 = vld [vmem:[%s1167_s1 + $0x38] sm:$0xff]  ;;  %v36_v13 = vld [vmem:[%s1166_s0 + $0x8] sm:$0xff]  ;;  %v139_v14 = vld [vmem:[#allocation2] sm:$0xff]  ;;  %s702_s18 = sshll.u32 %s1012_s17, 4  ;;  %s703_s18 = int_to_ptr.vmem [resolvable:$true] %s702_s18 }
  0x17   :  { %876 = vmatpush3.bf16.msra.mxu0 %v873_v3  ;;  %v885_v12 = vpack.c.bf16 %v44_v11, %v43_v10  ;;  %v140_v15 = vld [vmem:[#allocation2 + $0x8] sm:$0xff]  ;;  %v330_v16 = vld [vmem:[#allocation2 + $0x40] sm:$0xff]  ;;  %v141_v19 = vld [vmem:[#allocation2 + $0x10] sm:$0xff]  ;;  %p987_p9 = scmp.lt.s32.totalorder %s703_s18, %s703_s18 }
  0x18   :  { %878 = vmatprep.subr.bf16.mxu0 %v877_v5  ;;  %v889_v17 = vpack.c.bf16 %v140_v15, %v139_v14  ;;  %v331_v18 = vld [vmem:[#allocation2 + $0x48] sm:$0xff]  ;;  %v142_v20 = vld [vmem:[#allocation2 + $0x18] sm:$0x7f]  ;;  %vm1090_vm3 = vmpackc.low %vm157_vm1, %vm1011_vm2 }
  0x19   :  { %v909_v21 = vpack.c.bf16 %v331_v18, %v330_v16  ;;  %v893_v22 = vpack.c.bf16 %v142_v20, %v141_v19  ;;  %v332_v24 = vld [vmem:[#allocation2 + $0x50] sm:$0xff]  ;;  %v333_v25 = vld [vmem:[#allocation2 + $0x58] sm:$0x7f]  ;;  %v237_v27 = vld [vmem:[#allocation2 + $0x20] sm:$0xff] }
  0x1a   :  { %890 = vmatprep.subr.bf16.mxu1 %v889_v17  ;;  %v913_v26 = vpack.c.bf16 %v333_v25, %v332_v24  ;;  %v238_v28 = vld [vmem:[#allocation2 + $0x28] sm:$0xff]  ;;  %v516_v29 = vld [vmem:[#allocation2 + $0x80] sm:$0xff]  ;;  %v239_v43 = vld [vmem:[#allocation2 + $0x30] sm:$0xff] }
  0x1b   :  { %880 = vmatpush3.bf16.msra.mxu0 %v877_v5  ;;  %892 = vmatpush3.bf16.msra.mxu1 %v889_v17  ;;  %v899_v30 = vpack.c.bf16 %v238_v28, %v237_v27  ;;  %v517_v31 = vld [vmem:[#allocation2 + $0x88] sm:$0xff]  ;;  %v240_v44 = vld [vmem:[#allocation2 + $0x38] sm:$0x7f]  ;;  %v518_v45 = vld [vmem:[#allocation2 + $0x90] sm:$0xff] }
  0x1c   :  { %882 = vmatprep.subr.bf16.mxu0 %v881_v9  ;;  %895 = vmatprep.subr.msk.bf16.mxu1 %vm1090_vm3, %v893_v22  ;;  %v929_v32 = vpack.c.bf16 %v517_v31, %v516_v29  ;;  %v519_v46 = vld [vmem:[#allocation2 + $0x98] sm:$0x7f]  ;;  %v903_v49 = vpack.c.bf16 %v240_v44, %v239_v43  ;;  %v423_v51 = vld [vmem:[#allocation2 + $0x60] sm:$0xff]  ;;  %v424_v52 = vld [vmem:[#allocation2 + $0x68] sm:$0xff] }
  0x1d   :  { %v933_v50 = vpack.c.bf16 %v519_v46, %v518_v45  ;;  %v919_v53 = vpack.c.bf16 %v424_v52, %v423_v51  ;;  %v425_v54 = vld [vmem:[#allocation2 + $0x70] sm:$0xff]  ;;  %v426_v55 = vld [vmem:[#allocation2 + $0x78] sm:$0x7f]  ;;  %v608_v57 = vld [vmem:[%s1170_s4] sm:$0xff] }
  0x1e   :  { %v923_v56 = vpack.c.bf16 %v426_v55, %v425_v54  ;;  %v609_v58 = vld [vmem:[%s1170_s4 + $0x8] sm:$0xff]  ;;  %v610_v60 = vld [vmem:[%s1170_s4 + $0x10] sm:$0xff]  ;;  %v611_v61 = vld [vmem:[%s1170_s4 + $0x18] sm:$0xff] }
  0x1f   :  { %884 = vmatpush3.bf16.msra.mxu0 %v881_v9  ;;  %898 = vmatpush3.bf16.msk.msra.mxu1 %vm1090_vm3, %v893_v22  ;;  %v939_v59 = vpack.c.bf16 %v609_v58, %v608_v57  ;;  %v943_v62 = vpack.c.bf16 %v611_v61, %v610_v60  ;;  %v716_v3 = vld [vmem:[%s1169_s3] ss:$0 sm:$0xff]  ;;  %v721_v4 = vld [vmem:[%s1169_s3 + $0x1] ss:$0 sm:$0xff]  ;;  %v726_v5 = vld [vmem:[%s1169_s3 + $0x2] ss:$0 sm:$0xff] }
  0x20   :  { %886 = vmatprep.subr.bf16.mxu0 %v885_v12  ;;  %900 = vmatprep.subr.bf16.mxu1 %v899_v30  ;;  %v731_v19 = vld [vmem:[%s1169_s3 + $0x3] ss:$0 sm:$0xff] }
  0x23   :  { %888 = vmatpush3.bf16.msra.mxu0 %v885_v12 }
  0x24   :  { %910 = vmatprep.subr.bf16.mxu0 %v909_v21 }
  0x26   :  { %805 = vmatmul.mubr.msk.f32.vlgmr.msra.gmra.mrb[0].mxu0 %vm45_vm0, %v36_v13 }
  0x27   :  { %912 = vmatpush3.bf16.msra.mxu0 %v909_v21  ;;  %v736_v21 = vld [vmem:[%s1169_s3 + $0x4] ss:$0 sm:$0xff]  ;;  %s982_s3 = scalar_lea.vmem %s703_s18, 256 }
  0x28   :  { %915 = vmatprep.subr.msk.bf16.mxu0 %vm1090_vm3, %v913_v26  ;;  %p983_p8 = scmp.ne.s32.totalorder %s703_s18, %s982_s3  ;;  %p988_p10 = scmp.lt.s32.totalorder %s982_s3, %s982_s3 }
  0x2a   :  { %p989_p11 = por %p988_p10, %p987_p9 }
  0x2b   :  { %918 = vmatpush3.bf16.msk.msra.mxu0 %vm1090_vm3, %v913_v26 }
  0x2c   :  { %930 = vmatprep.subr.bf16.mxu0 %v929_v32  ;;  %p990_p12 = pnand %p989_p11, %p983_p8 }
  0xf9   :  { %v806_v33 = vpop.f32.mrb[0].mxu0 }
  0xfa   :  { %v128_v34 = vsub.f32 0.0, %v806_v33  ;;  %v118_v35 = vpop.f32.mrb[1].mxu0 }
  0xfb   :  { %v127_v36 = vsub.f32 0.0, %v118_v35 }
  0xfc   :  { %v131_v37 = vmul.f32 1.442695, %v128_v34 }
  0xfd   :  { %v129_v38 = vmul.f32 1.442695, %v127_v36 }
  0xfe   :  { %952 = vpow2.f32 %v131_v37 }
  0xff   :  { %954 = vpow2.f32 %v129_v38 }
 0x108   :  { %v953_v39 = vpop.eup %952 }
 0x109   :  { %v955_v40 = vpop.eup %954  ;;  %v134_v41 = vadd.f32 1.0, %v953_v39 }
 0x10a   :  { %v133_v42 = vadd.f32 1.0, %v955_v40 }
 0x10c   :  { %956 = vrcp.f32 %v133_v42 }
 0x10d   :  { %958 = vrcp.f32 %v134_v41 }
 0x116   :  { %v957_v47 = vpop.eup %956 }
 0x117   :  { %v959_v48 = vpop.eup %958  ;;  %815 = vmatprep.mubr.msk.f32.mxu1 %vm150_vm4, %v957_v47  ;;  %837 = vmatprep.mubr.msk.f32.mxu0 %vm150_vm4, %v957_v47 }
 0x118   :  { %816 = vmatmul.mubr.msk.f32.vlgmr.msra.gmra.mrb[0].mxu1 %vm150_vm4, %v959_v48  ;;  %838 = vmatmul.mubr.msk.f32.vlgmr.msra.gmra.mrb[2].mxu0 %vm150_vm4, %v959_v48 }
 0x119   :  { %902 = vmatpush3.bf16.msra.mxu1 %v899_v30  ;;  %932 = vmatpush3.bf16.msra.mxu0 %v929_v32 }
 0x11a   :  { %826 = vmatprep.mubr.msk.f32.mxu1 %vm150_vm4, %v957_v47  ;;  %859 = vmatprep.mubr.msk.f32.mxu0 %vm150_vm4, %v957_v47 }
 0x11b   :  { %905 = vmatprep.subr.msk.bf16.mxu1 %vm1090_vm3, %v903_v49  ;;  %935 = vmatprep.subr.msk.bf16.mxu0 %vm1090_vm3, %v933_v50 }
 0x11d   :  { %908 = vmatpush3.bf16.msk.msra.mxu1 %vm1090_vm3, %v903_v49  ;;  %938 = vmatpush3.bf16.msk.msra.mxu0 %vm1090_vm3, %v933_v50 }
 0x11e   :  { %920 = vmatprep.subr.bf16.mxu1 %v919_v53 }
 0x120   :  { %827 = vmatmul.mubr.msk.f32.vlgmr.msra.gmra.mrb[2].mxu1 %vm150_vm4, %v959_v48  ;;  %860 = vmatmul.mubr.msk.f32.vlgmr.msra.gmra.mrb[4].mxu0 %vm150_vm4, %v959_v48 }
 0x121   :  { %922 = vmatpush3.bf16.msra.mxu1 %v919_v53  ;;  %848 = vmatprep.mubr.msk.f32.mxu1 %vm150_vm4, %v957_v47 }
 0x122   :  { %925 = vmatprep.subr.msk.bf16.mxu1 %vm1090_vm3, %v923_v56 }
 0x125   :  { %928 = vmatpush3.bf16.msk.msra.mxu1 %vm1090_vm3, %v923_v56 }
 0x126   :  { %940 = vmatprep.subr.bf16.mxu1 %v939_v59 }
 0x128   :  { %849 = vmatmul.mubr.msk.f32.vlgmr.msra.gmra.mrb[4].mxu1 %vm150_vm4, %v959_v48 }
 0x129   :  { %942 = vmatpush3.bf16.msra.mxu1 %v939_v59 }
 0x12a   :  { %944 = vmatprep.subr.bf16.mxu1 %v943_v62 }
 0x12d   :  { %946 = vmatpush3.bf16.msra.mxu1 %v943_v62 }
 0x1eb   :  { %v817_v63 = vpop.f32.mrb[0].mxu1  ;;  %v839_v0 = vpop.f32.mrb[2].mxu0 }
 0x1ec   :  { %v227_v1 = vpop.f32.mrb[1].mxu1  ;;  %v411_v2 = vpop.f32.mrb[3].mxu0  ;;  %v233_v8 = vadd.f32 %v817_v63, %v716_v3  ;;  %v417_v14 = vadd.f32 %v839_v0, %v726_v5 }
 0x1ed   :  { %v228_v12 = vadd.f32 %v716_v3, %v227_v1  ;;  %v412_v16 = vadd.f32 %v726_v5, %v411_v2 }
 0x1f3   :  { %v828_v6 = vpop.f32.mrb[2].mxu1  ;;  %v861_v7 = vpop.f32.mrb[4].mxu0 }
 0x1f4   :  { %v324_v9 = vadd.f32 %v828_v6, %v721_v4  ;;  %v318_v10 = vpop.f32.mrb[3].mxu1  ;;  %v597_v11 = vpop.f32.mrb[5].mxu0  ;;  %v603_v26 = vadd.f32 %v861_v7, %v736_v21 }
 0x1f5   :  { %v319_v13 = vadd.f32 %v721_v4, %v318_v10  ;;  %v598_v28 = vadd.f32 %v736_v21, %v597_v11 }
 0x1f6   :  { %v328_v15 = vmul.f32 %v324_v9, %v233_v8 }
 0x1f7   :  { %v327_v17 = vmul.f32 %v319_v13, %v228_v12 }
 0x1f8   :  { %v421_v18 = vmul.f32 %v417_v14, %v328_v15 }
 0x1f9   :  { %v420_v20 = vmul.f32 %v412_v16, %v327_v17 }
 0x1fb   :  { %v850_v22 = vpop.f32.mrb[4].mxu1 }
 0x1fc   :  { %v510_v23 = vadd.f32 %v850_v22, %v731_v19  ;;  %v504_v24 = vpop.f32.mrb[5].mxu1 }
 0x1fd   :  { %v505_v25 = vadd.f32 %v731_v19, %v504_v24 }
 0x1fe   :  { %v514_v27 = vmul.f32 %v510_v23, %v421_v18 }
 0x1ff   :  { %v513_v29 = vmul.f32 %v505_v25, %v420_v20 }
 0x200   :  { %v607_v30 = vmul.f32 %v603_v26, %v514_v27 }
 0x201   :  { %v606_v31 = vmul.f32 %v598_v28, %v513_v29 }
 0x203   :  { %870 = vmatprep.mubr.msk.f32.mxu1 %vm612_vm5, %v606_v31 }
 0x204   :  { %871 = vmatmul.mubr.msk.f32.vlgmr.msra.gmra.mrb[6].mxu1 %vm612_vm5, %v607_v30 }
 0x2d7   :  { %v872_v32 = vpop.f32.mrb[6].mxu1 }
 0x2d8   :  { %696 = vst.msk [vmem:[#allocation5 + $0x8] sm:$0xff] %vm694_vm6, %v872_v32  ;;  %v685_v33 = vpop.f32.mrb[7].mxu1 }
 0x2d9   :  { %695 = vst.msk [vmem:[#allocation5] sm:$0xff] %vm694_vm6, %v685_v33 }
 0x2da   :  { %993 = shalt.err (!%p990_p12)
}
 0x2db   :  { %s994_s21 = scalar_lea.hbm %s1171_s5, 256 }
 0x2dc   :  { %p995_p13 = scmp.ne.s32.totalorder %s1171_s5, %s994_s21  ;;  %p998_p0 = scmp.lt.u32.totalorder %s994_s21, %s1171_s5 }
 0x2de   :  { %p1000_p1 = pnand %p998_p0, %p995_p13 }
 0x2e0   :  { %1003 = shalt.err (!%p1000_p1)
}
 0x2e1   :  { %708 = dma.vmem_to_hbm [thread:$0]  %s703_s18, 256, %s1171_s5, [#allocation4], %s1009_s28, %s1009_s28, %s1010_s29  }
 0x2e2   :  { %1006 = dma.done.wait [#allocation4], 256  }
 0x2e3   :  { %1007 = vsyncadd [#allocation4], 4294967040 }
 0x2e4   :  { %712 = vsyncpa [#allocation3], 1 }
 0x2e5   :  { %713 = vsyncpa [#allocation4], 1 }

</bundles_post_ra>
